<compile_context>
chip_gen: v7x
topology: tpu7x:2x2x1
jax: 0.10.0
libtpu: 0.0.40
codegen_flags: <defaults>
</compile_context>

<pallas_src>
import jax
import jax.numpy as jnp
from jax.experimental import pallas as pl
from jax.experimental.pallas import tpu as pltpu


def _conv_as_matmul_kernel(lhs_ref, rhs_ref, bias_ref, out_ref):
    """Single-invocation kernel: the whole 3x3 conv is one lane-dense MXU matmul.

    lhs_ref : (N*H, Kpad)      bf16  im2col patches, K zero-padded to 640 (lane-aligned)
    rhs_ref : (Kpad, W*Cout)   bf16  precomputed block-diagonal weight kron(I_W, w_flat)
    bias_ref: (1, W*Cout)      f32   bias tiled over the W axis
    out_ref : (N*H, W*Cout)    f32   lane-dense output slab (32, 128)
    """
    acc = jnp.dot(lhs_ref[...], rhs_ref[...],
                  preferred_element_type=jnp.float32)           # single MXU push
    out_ref[...] = (acc + bias_ref[...]).astype(out_ref.dtype)  # one f32 bias add


def conv3x3_same_pallas(x_nchw, rhs_padded, bias_row):
    """3x3, stride 1, padding 1 conv via one MXU matmul.

    x_nchw     : (N, Cin, H, W) f32 input (PyTorch layout)
    rhs_padded : (Kpad, W*Cout) bf16 precomputed block-diag weight (zero rows past K)
    bias_row   : (1, W*Cout)    f32 precomputed tiled bias
    """
    N, Cin, H, W = x_nchw.shape
    K = W * 9 * Cin                       # 576
    K_pad = rhs_padded.shape[0]           # 640 (multiple of 128)
    WCout = rhs_padded.shape[1]           # 128
    Cout = WCout // W

    # ---------- layout glue (pure plumbing; fused into the Pallas call's LHS) --------
    x_nhwc = jnp.transpose(x_nchw, (0, 2, 3, 1))                    # NCHW -> NHWC
    x_pad = jnp.pad(x_nhwc, ((0, 0), (1, 1), (1, 1), (0, 0)))       # zero pad H, W
    # im2col: patches[n,h,w,tap,ci] with tap = 3*dy + dx
    taps = [x_pad[:, dy:dy + H, dx:dx + W, :]
            for dy in range(3) for dx in range(3)]
    patches = jnp.stack(taps, axis=3)                               # (N, H, W, 9, Cin)
    lhs = patches.reshape(N * H, K).astype(jnp.bfloat16)            # (32, 576)
    lhs = jnp.pad(lhs, ((0, 0), (0, K_pad - K)))                    # (32, 640) lane-aligned

    flops = 2 * (N * H) * K_pad * WCout
    bytes_accessed = (lhs.size * 2 + rhs_padded.size * 2
                      + bias_row.size * 4 + (N * H) * WCout * 4)

    # ---------- single Pallas invocation, everything whole-array in VMEM -------------
    out2d = pl.pallas_call(
        _conv_as_matmul_kernel,
        out_shape=jax.ShapeDtypeStruct((N * H, WCout), jnp.float32),
        in_specs=[
            pl.BlockSpec(memory_space=pltpu.MemorySpace.VMEM),  # lhs  (32, 640)
            pl.BlockSpec(memory_space=pltpu.MemorySpace.VMEM),  # rhs  (640, 128)
            pl.BlockSpec(memory_space=pltpu.MemorySpace.VMEM),  # bias (1, 128)
        ],
        out_specs=pl.BlockSpec(memory_space=pltpu.MemorySpace.VMEM),
        compiler_params=pltpu.CompilerParams(
            # allow the im2col producer to fuse into the LHS operand
            allow_input_fusion=[True, False, False],
        ),
        cost_estimate=pl.CostEstimate(
            flops=flops, transcendentals=0, bytes_accessed=bytes_accessed),
    )(lhs, rhs_padded, bias_row)

    # ---------- back to the PyTorch NCHW layout ---------------------------------------
    out_nhwc = out2d.reshape(N, H, W, Cout)
    return jnp.transpose(out_nhwc, (0, 3, 1, 2)).astype(x_nchw.dtype)


# jit the whole forward; rhs/bias are passed through untouched (no per-call rebuild).
_conv_forward = jax.jit(conv3x3_same_pallas)


class Conv3x3Module:
    """Inner module wrapped by Ignore2ndArg (analogue of nn.Conv2d(4, 8, 3, padding=1))."""

    def __init__(self, cin, cout, width, key):
        kw, kb = jax.random.split(key)
        fan_in = cin * 3 * 3
        bound = 1.0 / (fan_in ** 0.5)
        # Weights stored in HWIO for the NHWC/im2col kernel.
        self.weight = jax.random.uniform(
            kw, (3, 3, cin, cout), jnp.float32, -bound, bound)
        self.bias = jax.random.uniform(
            kb, (cout,), jnp.float32, -bound, bound)

        # ---- one-time precompute of the Pallas matmul operands (perf opt #1) --------
        W = width
        K = W * 9 * cin                                   # 576
        K_pad = ((K + 127) // 128) * 128                  # 640, lane-aligned
        w_flat = self.weight.reshape(9 * cin, cout)       # (36, 8)
        rhs = jnp.kron(jnp.eye(W, dtype=jnp.float32), w_flat)       # (576, 128)
        rhs = jnp.pad(rhs, ((0, K_pad - K), (0, 0)))                 # (640, 128)
        self.rhs = jax.device_put(rhs.astype(jnp.bfloat16))
        self.bias_row = jax.device_put(
            jnp.tile(self.bias, W).reshape(1, W * cout).astype(jnp.float32))

    def __call__(self, x_nchw):
        return _conv_forward(x_nchw, self.rhs, self.bias_row)


class Ignore2ndArg:
    """JAX analogue of the PyTorch Ignore2ndArg wrapper."""

    def __init__(self, module):
        self.module = module

    def __call__(self, x, dummy_arg=None):
        # The dummy second argument is ignored, exactly as in the PyTorch module.
        # TODO(synk): torch.utils.checkpoint recomputation itself has no Pallas analogue;
        # only the forward semantics (ignore dummy, call inner module) are implemented.
        return self.module(x)


if __name__ == "__main__":
    key = jax.random.PRNGKey(0)
    k_in, k_mod, k_dummy = jax.random.split(key, 3)

    N, Cin, Hs, Ws, Cout = 2, 4, 16, 16, 8
    x = jax.random.normal(k_in, (N, Cin, Hs, Ws), jnp.float32)   # NCHW
    dummy = jax.random.normal(k_dummy, (1,), jnp.float32)        # ignored

    wrapped = Ignore2ndArg(Conv3x3Module(Cin, Cout, Ws, k_mod))
    y = wrapped(x, dummy)
    y = jax.block_until_ready(y)
    assert y.shape == (N, Cout, Hs, Ws)

    # Self-check against XLA's conv (same semantics as the wrapped nn.Conv2d).
    # Tolerance covers the bf16 rounding of the MXU operands (accumulation is f32).
    ref = jax.lax.conv_general_dilated(
        x, jnp.transpose(wrapped.module.weight, (3, 2, 0, 1)),   # HWIO -> OIHW
        window_strides=(1, 1), padding=((1, 1), (1, 1)),
        dimension_numbers=("NCHW", "OIHW", "NCHW"),
        precision=jax.lax.Precision.HIGHEST,
    ) + wrapped.module.bias[None, :, None, None]
    assert jnp.allclose(y, ref, atol=2e-2, rtol=2e-2)

    print("KERNEL_OK")
</pallas_src>

<mosaic_0001>
module attributes {stable_mosaic.version = 11 : i64} {
  func.func @_conv_as_matmul_kernel(%arg0: memref<32x640xbf16, #tpu.memory_space<vmem>>, %arg1: memref<640x128xbf16, #tpu.memory_space<vmem>>, %arg2: memref<1x128xf32, #tpu.memory_space<vmem>>, %arg3: memref<32x128xf32, #tpu.memory_space<vmem>>) attributes {dimension_semantics = [], scalar_prefetch = 0 : i64, scratch_operands = 0 : i64, tpu.core_type = #tpu.core_type<tc>} {
    %c0 = arith.constant 0 : index
    %c0_0 = arith.constant 0 : index
    %0 = vector.load %arg0[%c0, %c0_0] : memref<32x640xbf16, #tpu.memory_space<vmem>>, vector<32x640xbf16>
    %c0_1 = arith.constant 0 : index
    %c0_2 = arith.constant 0 : index
    %1 = vector.load %arg1[%c0_1, %c0_2] : memref<640x128xbf16, #tpu.memory_space<vmem>>, vector<640x128xbf16>
    %cst = arith.constant dense<0.000000e+00> : vector<32x128xf32>
    %2 = tpu.matmul %0, %1, %cst {dimension_numbers = #tpu.dot_dimension_numbers<[1], [0], [0], [1], [0, 0, 1, 1], [], []>} : vector<32x640xbf16>, vector<640x128xbf16>, vector<32x128xf32> -> vector<32x128xf32>
    %c0_3 = arith.constant 0 : index
    %c0_4 = arith.constant 0 : index
    %3 = vector.load %arg2[%c0_3, %c0_4] : memref<1x128xf32, #tpu.memory_space<vmem>>, vector<1x128xf32>
    %4 = vector.broadcast %3 : vector<1x128xf32> to vector<32x128xf32>
    %5 = arith.addf %2, %4 : vector<32x128xf32>
    %c0_5 = arith.constant 0 : index
    %c0_6 = arith.constant 0 : index
    %6 = vector.load %arg3[%c0_5, %c0_6] : memref<32x128xf32, #tpu.memory_space<vmem>>, vector<32x128xf32>
    tpu.vector_store %arg3[%c0_5, %c0_6], %5 {strides = array<i32>} : memref<32x128xf32, #tpu.memory_space<vmem>>, vector<32x128xf32>,
    return
  }
}

</mosaic_0001>

<bundles_post_ra>
// kernel: conv3x3_same_pallas.2
= control target key start
LH: loop header
LB: loop body
LE: loop exit
PB: predicated region body
PF: predicated region fallthrough
CT: control target
= control target key end

     0   :  { %s1315_s0 = inlined_call_operand.vmem [shape: bf16[640,128], index: 0, kind: input, shape index: {}]   ;;  %s1316_s1 = inlined_call_operand.vmem [shape: f32[1,128], index: 1, kind: input, shape index: {}]   ;;  %s1317_s2 = inlined_call_operand.vmem [shape: bf16[32,576], index: 2, kind: input, shape index: {}]   ;;  %s1318_s3 = inlined_call_operand.<no memory space> [shape: bf16[], index: 3, kind: input, shape index: {}]   ;;  %s1319_s4 = inlined_call_operand.vmem [shape: f32[32,128], index: 4, kind: output, shape index: {}]  }
   0x1   :  { %v9_v0 = vstv %s1318_s3 }
   0x2   :  { %v1137_v1 = vunpack.i.l.bf16 %v9_v0 }
   0x3   :  { %v1058_v2 = vld [vmem:[%s1315_s0 + $0x40] sm:$0xff]   ;;  %v1062_v6 = vld [vmem:[%s1315_s0 + $0x48] sm:$0xff]   ;;  %v1066_v10 = vld [vmem:[%s1315_s0 + $0x50] sm:$0xff]   ;;  %v83_v22 = vlaneseq }
   0x4   :  { %v1059_v3 = vld [vmem:[%s1315_s0] sm:$0xff]   ;;  %971 = vmatprep.subr.bf16.mxu0 %v1058_v2  ;;  %v1063_v7 = vld [vmem:[%s1315_s0 + $0x8] sm:$0xff]   ;;  %v1067_v11 = vld [vmem:[%s1315_s0 + $0x10] sm:$0xff]  }
   0x5   :  { %v1060_v4 = vld [vmem:[%s1315_s0 + $0xc0] sm:$0xff]   ;;  %972 = vmatpush3.bf16.msra.mxu0 %v1059_v3  ;;  %v1064_v8 = vld [vmem:[%s1315_s0 + $0xc8] sm:$0xff]   ;;  %v1068_v12 = vld [vmem:[%s1315_s0 + $0xd0] sm:$0xff]   ;;  %v84_v27 = vand.u32 127, %v83_v22 }
   0x6   :  { %v1061_v5 = vld [vmem:[%s1315_s0 + $0x80] sm:$0xff]   ;;  %999 = vmatprep.subr.bf16.mxu1 %v1060_v4  ;;  %973 = vmatprep.subr.bf16.mxu0 %v1062_v6  ;;  %v1065_v9 = vld [vmem:[%s1315_s0 + $0x88] sm:$0xff]   ;;  %v1069_v13 = vld [vmem:[%s1315_s0 + $0x90] sm:$0xff]  }
   0x7   :  { %1000 = vmatpush3.bf16.msra.mxu1 %v1061_v5  ;;  %v1070_v14 = vld [vmem:[%s1315_s0 + $0x58] sm:$0xff]   ;;  %v1074_v18 = vld [vmem:[%s1315_s0 + $0x60] sm:$0xff]   ;;  %v1078_v23 = vld [vmem:[%s1315_s0 + $0x68] sm:$0xff]   ;;  %v85_v32 = vadd.s32 512, %v84_v27  ;;  %v1108_v5 = vmov 0.0  }
   0x8   :  { %1001 = vmatprep.subr.bf16.mxu1 %v1064_v8  ;;  %v1071_v15 = vld [vmem:[%s1315_s0 + $0x18] sm:$0xff]   ;;  %v1075_v19 = vld [vmem:[%s1315_s0 + $0x20] sm:$0xff]   ;;  %v1079_v24 = vld [vmem:[%s1315_s0 + $0x28] sm:$0xff]  }
   0x9   :  { %974 = vmatpush3.bf16.msra.mxu0 %v1063_v7  ;;  %v1072_v16 = vld [vmem:[%s1315_s0 + $0xd8] sm:$0xff]   ;;  %v1076_v20 = vld [vmem:[%s1315_s0 + $0xe0] sm:$0xff]   ;;  %v1080_v25 = vld [vmem:[%s1315_s0 + $0xe8] sm:$0xff]   ;;  %vm86_vm0 = vcmp.lt.s32.totalorder %v85_v32, 576 }
   0xa   :  { %975 = vmatprep.subr.bf16.mxu0 %v1066_v10  ;;  %v1073_v17 = vld [vmem:[%s1315_s0 + $0x98] sm:$0xff]   ;;  %v1077_v21 = vld [vmem:[%s1315_s0 + $0xa0] sm:$0xff]   ;;  %v1081_v26 = vld [vmem:[%s1315_s0 + $0xa8] sm:$0xff]  }
   0xb   :  { %1002 = vmatpush3.bf16.msra.mxu1 %v1065_v9  ;;  %v1082_v28 = vld [vmem:[%s1315_s0 + $0x70] sm:$0xff]   ;;  %v1086_v33 = vld [vmem:[%s1315_s0 + $0x78] sm:$0xff]   ;;  %v20_v36 = vld [vmem:[%s1317_s2] sm:$0xff]  }
   0xc   :  { %1003 = vmatprep.subr.bf16.mxu1 %v1068_v12  ;;  %v1083_v29 = vld [vmem:[%s1315_s0 + $0x30] sm:$0xff]   ;;  %v1087_v34 = vld [vmem:[%s1315_s0 + $0x38] sm:$0xff]   ;;  %30 = vst [vmem:[#allocation7] sm:$0xff] %v20_v36   ;;  %v1094_v43 = vld [vmem:[%s1315_s0 + $0x100] sm:$0xff]  }
   0xd   :  { %976 = vmatpush3.bf16.msra.mxu0 %v1067_v11  ;;  %v1084_v30 = vld [vmem:[%s1315_s0 + $0xf0] sm:$0xff]   ;;  %v1088_v35 = vld [vmem:[%s1315_s0 + $0xf8] sm:$0xff]   ;;  %v1095_v45 = vld [vmem:[%s1317_s2 + $0x8] sm:$0xff]  }
   0xe   :  { %977 = vmatprep.subr.bf16.mxu0 %v1070_v14  ;;  %v1085_v31 = vld [vmem:[%s1315_s0 + $0xb0] sm:$0xff]   ;;  %v1089_v40 = vld [vmem:[%s1317_s2 + $0x18] sm:$0xff]   ;;  %v868_v46 = vld [vmem:[%s1317_s2 + $0x20] sm:$0xf] }
   0xf   :  { %1004 = vmatpush3.bf16.msra.mxu1 %v1069_v13  ;;  %v864_v37 = vld [vmem:[%s1317_s2 + $0x10] sm:$0xff]   ;;  %v1093_v41 = vld [vmem:[%s1315_s0 + $0xb8] sm:$0xff]   ;;  %945 = vst [vmem:[#allocation7 + $0x18] sm:$0xff] %v1089_v40   ;;  %143 = vst [vmem:[#allocation7 + $0x20] sm:$0xf] %v868_v46 }
  0x10   :  { %1005 = vmatprep.subr.bf16.mxu1 %v1072_v16  ;;  %v81_v38 = vunpack.c.l.bf16 %v864_v37  ;;  %v938_v39 = vunpack.c.h.bf16 %v864_v37  ;;  %v1100_v47 = vld [vmem:[%s1317_s2 + $0x28] sm:$0xff]   ;;  %v874_v48 = vld [vmem:[%s1317_s2 + $0x38] sm:$0xff]   ;;  %v1101_v51 = vld [vmem:[%s1317_s2 + $0x40] sm:$0xff]  }
  0x11   :  { %978 = vmatpush3.bf16.msra.mxu0 %v1071_v15  ;;  %v229_v49 = vunpack.c.l.bf16 %v874_v48  ;;  %v958_v50 = vunpack.c.h.bf16 %v874_v48  ;;  %v1096_v53 = vld [vmem:[%s1315_s0 + $0x108] sm:$0xff]   ;;  %965 = vst [vmem:[#allocation7 + $0x40] sm:$0xff] %v1101_v51   ;;  %v1103_v60 = vld [vmem:[%s1317_s2 + $0x30] sm:$0xff]   ;;  %v1098_v8 = vld [vmem:[%s1315_s0 + $0x118] sm:$0xff]  }
  0x12   :  { %979 = vmatprep.subr.bf16.mxu0 %v1074_v18  ;;  %v87_v42 = vsel %vm86_vm0, %v81_v38, %v1137_v1  ;;  %v878_v61 = vld [vmem:[%s1317_s2 + $0x48] sm:$0xf]  ;;  %v869_v62 = vld [vmem:[%s1317_s2 + $0x24] ss:$40 sps:$4 sm:$0xff]   ;;  %v1097_v63 = vld [vmem:[%s1315_s0 + $0x110] sm:$0xff]  }
  0x13   :  { %1006 = vmatpush3.bf16.msra.mxu1 %v1073_v17  ;;  %v939_v44 = vpack.c.bf16 %v938_v39, %v87_v42  ;;  %v235_v58 = vsel %vm86_vm0, %v229_v49, %v1137_v1  ;;  %291 = vst [vmem:[#allocation7 + $0x48] sm:$0xf] %v878_v61  ;;  %v155_v0 = vunpack.c.l.bf16 %v869_v62  ;;  %v303_v2 = vunpack.c.h.bf16 %v869_v62  ;;  %v1102_v15 = vld [vmem:[%s1315_s0 + $0x128] sm:$0xff]   ;;  %v1104_v17 = vld [vmem:[%s1315_s0 + $0x130] sm:$0xff]   ;;  %v1105_v18 = vld [vmem:[%s1315_s0 + $0x138] sm:$0xff]  }
  0x14   :  { %1007 = vmatprep.subr.bf16.mxu1 %v1076_v20  ;;  %v959_v59 = vpack.c.bf16 %v958_v50, %v235_v58  ;;  %v880_v22 = vld [vmem:[%s1316_s1] ss:$0 sm:$0xff] }
  0x15   :  { %980 = vmatpush3.bf16.msra.mxu0 %v1075_v19  ;;  %940 = vst [vmem:[#allocation7 + $0x10] sm:$0xff] %v939_v44   ;;  %v161_v3 = vsel %vm86_vm0, %v155_v0, %v1137_v1  ;;  %v309_v4 = vsel %vm86_vm0, %v303_v2, %v1137_v1  ;;  %v1099_v1 = vld [vmem:[%s1315_s0 + $0x120] sm:$0xff]  }
  0x16   :  { %981 = vmatprep.subr.bf16.mxu0 %v1078_v23  ;;  %v319_v52 = vld [vmem:[#allocation7 + $0x1c] sm:$0xff]  ;;  %v1092_v55 = vld [vmem:[#allocation7 + $0x4] ss:$20 sps:$4 sm:$0xff]   ;;  %960 = vst [vmem:[#allocation7 + $0x38] sm:$0xff] %v959_v59   ;;  %v163_v6 = vpack.c.bf16 %v1108_v5, %v161_v3  ;;  %v311_v7 = vpack.c.bf16 %v1108_v5, %v309_v4 }
  0x17   :  { %1008 = vmatpush3.bf16.msra.mxu1 %v1077_v21  ;;  %v883_v56 = vcombine.low %v1095_v45, %v319_v52  ;;  %v884_v57 = vcombine.high %v1095_v45, %v319_v52  ;;  %738 = vmatprep.mubr.bf16.mxu0 %v1092_v55 }
  0x18   :  { %1009 = vmatprep.subr.bf16.mxu1 %v1080_v25  ;;  %165 = vst [vmem:[#allocation7 + $0x24] sm:$0xf] %v163_v6  ;;  %313 = vst [vmem:[#allocation7 + $0x4c] sm:$0xf] %v311_v7 }
  0x19   :  { %982 = vmatpush3.bf16.msra.mxu0 %v1079_v24  ;;  %787 = vmatprep.mubr.bf16.mxu1 %v884_v57 }
  0x1a   :  { %983 = vmatprep.subr.bf16.mxu0 %v1082_v28  ;;  %v325_v10 = vld [vmem:[#allocation7 + $0x44] sm:$0xff] }
  0x1b   :  { %1010 = vmatpush3.bf16.msra.mxu1 %v1081_v26  ;;  %v889_v13 = vcombine.high %v1103_v60, %v325_v10  ;;  %v888_v14 = vcombine.low %v1103_v60, %v325_v10 }
  0x1c   :  { %1011 = vmatprep.subr.bf16.mxu1 %v1084_v30  ;;  %v1090_v54 = vld [vmem:[#allocation7] ss:$20 sps:$4 sm:$0xff]  }
  0x1d   :  { %984 = vmatpush3.bf16.msra.mxu0 %v1083_v29  ;;  %v324_v9 = vld [vmem:[#allocation7 + $0x3c] sm:$0xff] }
  0x1e   :  { %985 = vmatprep.subr.bf16.mxu0 %v1086_v33  ;;  %v887_v11 = vcombine.high %v1100_v47, %v324_v9  ;;  %v886_v12 = vcombine.low %v1100_v47, %v324_v9 }
  0x1f   :  { %1012 = vmatpush3.bf16.msra.mxu1 %v1085_v31  ;;  %v1106_v16 = vld [vmem:[#allocation7 + $0x10] ss:$20 sps:$4 sm:$0xff]   ;;  %v1107_v19 = vld [vmem:[#allocation7 + $0x38] ss:$20 sps:$4 sm:$0xff]  }
  0x20   :  { %1013 = vmatprep.subr.bf16.mxu1 %v1088_v35 }
  0x21   :  { %986 = vmatpush3.bf16.msra.mxu0 %v1087_v34 }
  0x22   :  { %1037 = vmatprep.subr.bf16.mxu0 %v1094_v43 }
  0x23   :  { %1014 = vmatpush3.bf16.msra.mxu1 %v1093_v41 }
  0x24   :  { %739 = vmatmul.mubr.bf16.vlgmr.msra.gmra.mrb[0].mxu0 %v1090_v54 }
  0x25   :  { %1038 = vmatpush3.bf16.msra.mxu0 %v1094_v43  ;;  %746 = vmatprep.mubr.bf16.mxu0 %v887_v11 }
  0x26   :  { %788 = vmatmul.mubr.bf16.vlgmr.msra.gmra.mrb[0].mxu1 %v883_v56  ;;  %1039 = vmatprep.subr.bf16.mxu0 %v1096_v53 }
  0x27   :  { %795 = vmatprep.mubr.bf16.mxu1 %v889_v13 }
  0x29   :  { %1040 = vmatpush3.bf16.msra.mxu0 %v1096_v53 }
  0x2a   :  { %1041 = vmatprep.subr.bf16.mxu0 %v1097_v63 }
  0x2c   :  { %747 = vmatmul.mubr.bf16.gmra.mrb[4].mxu0 %v886_v12 }
  0x2d   :  { %1042 = vmatpush3.bf16.msra.mxu0 %v1097_v63  ;;  %1053 = vmatprep.mubr.bf16.mxu0 %v1106_v16 }
  0x2e   :  { %1043 = vmatprep.subr.bf16.mxu0 %v1098_v8  ;;  %796 = vmatmul.mubr.bf16.gmra.mrb[4].mxu1 %v888_v14 }
  0x31   :  { %1044 = vmatpush3.bf16.msra.mxu0 %v1098_v8 }
  0x32   :  { %1045 = vmatprep.subr.bf16.mxu0 %v1099_v1 }
  0x35   :  { %1046 = vmatpush3.bf16.msra.mxu0 %v1099_v1 }
  0x36   :  { %1047 = vmatprep.subr.bf16.mxu0 %v1102_v15 }
  0x39   :  { %1048 = vmatpush3.bf16.msra.mxu0 %v1102_v15 }
  0x3a   :  { %1049 = vmatprep.subr.bf16.mxu0 %v1104_v17 }
  0x3d   :  { %1050 = vmatpush3.bf16.msra.mxu0 %v1104_v17 }
  0x3e   :  { %1051 = vmatprep.subr.bf16.mxu0 %v1105_v18 }
  0x41   :  { %1052 = vmatpush3.bf16.msra.mxu0 %v1105_v18 }
  0x44   :  { %1054 = vmatmul.mubr.bf16.vlgmr.msra.gmra.mrb[8].mxu0 %v1107_v19 }
  0xf7   :  { %v987_v20 = vpop.f32.mrb[0].mxu0 }
  0xf8   :  { %v988_v23 = vpop.f32.mrb[1].mxu0 }
  0xf9   :  { %v1015_v21 = vpop.f32.mrb[0].mxu1  ;;  %v989_v25 = vadd.f32 %v988_v23, %v987_v20  ;;  %v990_v26 = vpop.f32.mrb[2].mxu0 }
  0xfa   :  { %v1016_v24 = vpop.f32.mrb[1].mxu1  ;;  %v991_v29 = vpop.f32.mrb[3].mxu0 }
  0xfb   :  { %v1017_v27 = vadd.f32 %v1016_v24, %v1015_v21  ;;  %v1018_v28 = vpop.f32.mrb[2].mxu1  ;;  %v741_v31 = vadd.f32 %v989_v25, %v880_v22  ;;  %v992_v32 = vadd.f32 %v991_v29, %v990_v26 }
  0xfc   :  { %v1019_v30 = vpop.f32.mrb[3].mxu1 }
  0xfd   :  { %v1020_v33 = vadd.f32 %v1019_v30, %v1018_v28  ;;  %v744_v34 = vadd.f32 %v992_v32, %v880_v22  ;;  %v790_v35 = vadd.f32 %v1017_v27, %v741_v31 }
  0xff   :  { %v793_v36 = vadd.f32 %v1020_v33, %v744_v34  ;;  %v993_v37 = vpop.f32.mrb[4].mxu0 }
 0x100   :  { %v994_v38 = vpop.f32.mrb[5].mxu0 }
 0x101   :  { %v1021_v39 = vpop.f32.mrb[4].mxu1  ;;  %v995_v40 = vadd.f32 %v994_v38, %v993_v37  ;;  %v996_v41 = vpop.f32.mrb[6].mxu0 }
 0x102   :  { %v1022_v42 = vpop.f32.mrb[5].mxu1  ;;  %v997_v43 = vpop.f32.mrb[7].mxu0 }
 0x103   :  { %v1023_v44 = vadd.f32 %v1022_v42, %v1021_v39  ;;  %v1024_v45 = vpop.f32.mrb[6].mxu1  ;;  %v749_v46 = vadd.f32 %v995_v40, %v880_v22  ;;  %v998_v47 = vadd.f32 %v997_v43, %v996_v41 }
 0x104   :  { %v1025_v48 = vpop.f32.mrb[7].mxu1 }
 0x105   :  { %v1026_v49 = vadd.f32 %v1025_v48, %v1024_v45  ;;  %v752_v50 = vadd.f32 %v998_v47, %v880_v22  ;;  %v798_v51 = vadd.f32 %v1023_v44, %v749_v46 }
 0x107   :  { %v801_v52 = vadd.f32 %v1026_v49, %v752_v50 }
 0x117   :  { %v1055_v53 = vpop.f32.mrb[8].mxu0 }
 0x118   :  { %v847_v54 = vadd.f32 %v1055_v53, %v798_v51  ;;  %v838_v55 = vpop.f32.mrb[9].mxu0 }
 0x119   :  { %v839_v56 = vadd.f32 %v838_v55, %v790_v35  ;;  %v1056_v57 = vpop.f32.mrb[10].mxu0 }
 0x11a   :  { %855 = vst [vmem:[%s1319_s4 + $0x10] sm:$0xff] %v847_v54  ;;  %v850_v58 = vadd.f32 %v1056_v57, %v801_v52  ;;  %v841_v59 = vpop.f32.mrb[11].mxu0 }
 0x11b   :  { %853 = vst [vmem:[%s1319_s4] sm:$0xff] %v839_v56  ;;  %v842_v60 = vadd.f32 %v841_v59, %v793_v36 }
 0x11c   :  { %856 = vst [vmem:[%s1319_s4 + $0x18] sm:$0xff] %v850_v58 }
 0x11d   :  { %854 = vst [vmem:[%s1319_s4 + $0x8] sm:$0xff] %v842_v60 }

</bundles_post_ra>
